<compile_context>
chip_gen: v5e
topology: v5e:2x2
jax: 0.10.0
libtpu: 0.0.40
codegen_flags: <defaults>
</compile_context>

<pallas_src>
import jax
import jax.numpy as jnp
from jax.experimental import pallas as pl
from jax.experimental.pallas import tpu as pltpu


def _cdiv(a, b):
    return -(-a // b)


def _round_up(x, m):
    return ((x + m - 1) // m) * m


def _arm_kernel(state_ref, hx_ref, alpha_prev_ref, g_ref, a_ref, beta_ref,
                wf_w_ref, wf_b_ref, wh_w_ref, wh_b_ref,
                wx_w_ref, wx_b_ref, yh_w_ref, yh_b_ref,
                hx_out_ref, yt_out_ref, alpha_out_ref):
    state = state_ref[...]            # (TM, I)  f32
    hx = hx_ref[...]                  # (TM, H)  f32
    alpha_prev = alpha_prev_ref[...]  # (TM, I)  f32
    g = g_ref[...]                    # (TM, I)  f32
    a = a_ref[...]                    # (TM, 1)  f32
    beta = beta_ref[...]              # (TM, 1)  f32

    def log_softmax(v):               # stable log-softmax over the feature axis
        m = jnp.max(v, axis=-1, keepdims=True)
        return v - (m + jnp.log(jnp.sum(jnp.exp(v - m), axis=-1, keepdims=True)))

    # --- Attention weight output (bf16 MXU operands, f32 accumulate) ----------
    s = jnp.dot(state.astype(jnp.bfloat16), wf_w_ref[...],
                preferred_element_type=jnp.float32) + wf_b_ref[...]      # (TM, H)
    h = jnp.dot(hx.astype(jnp.bfloat16), wh_w_ref[...],
                preferred_element_type=jnp.float32) + wh_b_ref[...]      # (TM, H)
    s_h_sum = s + h

    k_t = jnp.tanh(a * s_h_sum)                                          # (TM, H)
    s_t = jnp.dot(k_t.astype(jnp.bfloat16), wx_w_ref[...],
                  preferred_element_type=jnp.float32) + wx_b_ref[...]    # (TM, I)
    alpha_now = log_softmax(s_t)
    # NOTE: `g` is used directly as an interpolation gate (no squashing) —
    # this mirrors the PyTorch reference exactly.
    alpha_new = jax.nn.sigmoid(alpha_now * g + alpha_prev * (1.0 - g))   # (TM, I)
    yt_in = log_softmax(alpha_new * beta) * state                        # (TM, I)
    # Final dot kept fully f32 (K = I = 16, precision-sensitive mix).
    yt = jnp.dot(yt_in, yh_w_ref[...],
                 preferred_element_type=jnp.float32) + yh_b_ref[...]     # (TM, H)

    # --- Recurrent output -----------------------------------------------------
    rt = jax.nn.sigmoid(s_h_sum)
    zt = rt  # reference applies sigmoid to the identical pre-activation: compute once
    hx_hat = jnp.tanh(rt * h + s)
    hx_new = hx_hat * zt + hx * (1.0 - zt)                               # (TM, H)

    hx_out_ref[...] = hx_new
    yt_out_ref[...] = yt
    alpha_out_ref[...] = alpha_new


def arm_forward(params, state, hidden, alpha_prev):
    # TODO(synk): if ARM is rolled over T timesteps, fuse the recurrence into one
    # kernel (grid axis over T, hx/alpha carried in VMEM scratch, weights resident);
    # the reference forward() is a single step, so this wrapper mirrors that.
    hx, _yx = hidden
    N, I = state.shape
    H = hx.shape[1]

    # Row tile: big enough to amortize the ~0.35 us/step grid overhead, small
    # enough that the double-buffered, lane-padded (128-lane) VMEM working set
    # stays well under the scoped-VMEM budget on every generation, and capped
    # at ceil(N/2) so the parallel grid has >= 2 steps (v7x megacore).
    cap = 2048
    tm = min(cap, _round_up(_cdiv(N, 2), 8))
    if tm >= N:
        tm = N                      # single full-array block (also valid layout-wise)
    grid = (_cdiv(N, tm),)          # no input padding; edge blocks are masked

    # bf16 weight operands (halves weight DMA, native MXU path); biases stay
    # f32; Yh weight stays f32 (precision-sensitive final dot).
    wf_w = params["wf_w"].astype(jnp.bfloat16)
    wh_w = params["wh_w"].astype(jnp.bfloat16)
    wx_w = params["wx_w"].astype(jnp.bfloat16)

    row_inputs = (state, hx, alpha_prev, params["g"], params["a"], params["beta"])
    weight_inputs = (wf_w, params["wf_b"], wh_w, params["wh_b"],
                     wx_w, params["wx_b"], params["yh_w"], params["yh_b"])

    def row_spec(arr):      # tiled over the env/batch rows
        return pl.BlockSpec((tm, arr.shape[1]), lambda i: (i, 0))

    def resident_spec(arr):  # constant index_map -> stays VMEM-resident across steps
        return pl.BlockSpec(arr.shape, lambda i: (0, 0))

    out_shapes = (jax.ShapeDtypeStruct((N, H), jnp.float32),   # hx_new
                  jax.ShapeDtypeStruct((N, H), jnp.float32),   # yt
                  jax.ShapeDtypeStruct((N, I), jnp.float32))   # alpha_new
    out_specs = (pl.BlockSpec((tm, H), lambda i: (i, 0)),
                 pl.BlockSpec((tm, H), lambda i: (i, 0)),
                 pl.BlockSpec((tm, I), lambda i: (i, 0)))

    hx_new, yt, alpha_new = pl.pallas_call(
        _arm_kernel,
        grid=grid,
        out_shape=out_shapes,
        in_specs=[row_spec(x) for x in row_inputs]
                 + [resident_spec(w) for w in weight_inputs],
        out_specs=out_specs,
        compiler_params=pltpu.CompilerParams(
            dimension_semantics=("parallel",),
            vmem_limit_bytes=48 << 20),
    )(*row_inputs, *weight_inputs)

    # Scalar parameter means / detach are trivial glue; computed in plain JAX.
    a_mean = jnp.mean(params["a"])
    beta_mean = jnp.mean(params["beta"])
    return (hx_new, yt), jax.lax.stop_gradient(alpha_new), a_mean, beta_mean


def arm_reference(params, state, hidden, alpha_prev):
    """Pure-JAX f32 reference mirroring the PyTorch module."""
    hx, _ = hidden
    s = state @ params["wf_w"] + params["wf_b"]
    h = hx @ params["wh_w"] + params["wh_b"]
    s_h_sum = s + h
    k_t = jnp.tanh(params["a"] * s_h_sum)
    s_t = k_t @ params["wx_w"] + params["wx_b"]
    alpha_now = jax.nn.log_softmax(s_t, axis=1)
    alpha_new = jax.nn.sigmoid(alpha_now * params["g"] + alpha_prev * (1.0 - params["g"]))
    yt = (jax.nn.log_softmax(alpha_new * params["beta"], axis=1) * state) \
        @ params["yh_w"] + params["yh_b"]
    rt = jax.nn.sigmoid(s_h_sum)
    zt = jax.nn.sigmoid(s_h_sum)
    hx_hat = jnp.tanh(rt * h + s)
    hx_new = hx_hat * zt + hx * (1.0 - zt)
    return (hx_new, yt), alpha_new


def init_params(key, input_size, hidden_size, num_env):
    """Deterministic synthetic init.  Linear weights stored pre-transposed as
    (in_features, out_features); biases as (1, out_features)."""
    ks = jax.random.split(key, 9)

    def linear(kw, kb, fan_in, fan_out):
        bound = 1.0 / jnp.sqrt(fan_in)
        w = jax.random.uniform(kw, (fan_in, fan_out), jnp.float32, -bound, bound)
        b = jax.random.uniform(kb, (1, fan_out), jnp.float32, -bound, bound)
        return w, b

    wf_w, wf_b = linear(ks[0], ks[1], input_size, hidden_size)   # Wf
    wh_w, wh_b = linear(ks[2], ks[3], hidden_size, hidden_size)  # Wh
    wx_w, wx_b = linear(ks[4], ks[5], hidden_size, input_size)   # Wx
    yh_w, yh_b = linear(ks[6], ks[7], input_size, hidden_size)   # Yh

    return {
        "wf_w": wf_w, "wf_b": wf_b,
        "wh_w": wh_w, "wh_b": wh_b,
        "wx_w": wx_w, "wx_b": wx_b,
        "yh_w": yh_w, "yh_b": yh_b,
        "a": jnp.ones((num_env, 1), jnp.float32),
        "beta": jnp.ones((num_env, 1), jnp.float32),
        "g": jax.random.normal(ks[8], (num_env, input_size), jnp.float32),
    }


if __name__ == "__main__":
    input_size, hidden_size, num_env = 16, 32, 2

    key = jax.random.PRNGKey(0)
    kp, ks, kh, ka = jax.random.split(key, 4)

    params = init_params(kp, input_size, hidden_size, num_env)
    state = jax.random.normal(ks, (num_env, input_size), jnp.float32)
    hx = jax.random.normal(kh, (num_env, hidden_size), jnp.float32)
    yx = jnp.zeros((num_env, hidden_size), jnp.float32)       # unused by forward
    alpha_prev = jax.random.normal(ka, (num_env, input_size), jnp.float32)

    (hx_new, yt), alpha_new, a_mean, beta_mean = arm_forward(
        params, state, (hx, yx), alpha_prev)
    jax.block_until_ready((hx_new, yt, alpha_new, a_mean, beta_mean))

    assert hx_new.shape == (num_env, hidden_size)
    assert yt.shape == (num_env, hidden_size)
    assert alpha_new.shape == (num_env, input_size)
    assert bool(jnp.all(jnp.isfinite(hx_new))) and bool(jnp.all(jnp.isfinite(yt)))

    # Loose-tolerance check vs. pure-JAX f32 reference (kernel uses bf16 MXU
    # operands for the Wf/Wh/Wx dots, so allow a generous margin).
    (hx_ref, yt_ref), alpha_ref = arm_reference(params, state, (hx, yx), alpha_prev)
    assert bool(jnp.allclose(hx_new, hx_ref, atol=5e-2, rtol=5e-2))
    assert bool(jnp.allclose(yt, yt_ref, atol=5e-2, rtol=5e-2))
    assert bool(jnp.allclose(alpha_new, alpha_ref, atol=5e-2, rtol=5e-2))

    print("KERNEL_OK")
</pallas_src>

<mosaic_0001>
module attributes {stable_mosaic.version = 11 : i64} {
  func.func @_arm_kernel(%arg0: i32, %arg1: memref<2x16xf32, #tpu.memory_space<vmem>>, %arg2: memref<2x32xf32, #tpu.memory_space<vmem>>, %arg3: memref<2x16xf32, #tpu.memory_space<vmem>>, %arg4: memref<2x16xf32, #tpu.memory_space<vmem>>, %arg5: memref<2x1xf32, #tpu.memory_space<vmem>>, %arg6: memref<2x1xf32, #tpu.memory_space<vmem>>, %arg7: memref<16x32xbf16, #tpu.memory_space<vmem>>, %arg8: memref<1x32xf32, #tpu.memory_space<vmem>>, %arg9: memref<32x32xbf16, #tpu.memory_space<vmem>>, %arg10: memref<1x32xf32, #tpu.memory_space<vmem>>, %arg11: memref<32x16xbf16, #tpu.memory_space<vmem>>, %arg12: memref<1x16xf32, #tpu.memory_space<vmem>>, %arg13: memref<16x32xf32, #tpu.memory_space<vmem>>, %arg14: memref<1x32xf32, #tpu.memory_space<vmem>>, %arg15: memref<2x32xf32, #tpu.memory_space<vmem>>, %arg16: memref<2x32xf32, #tpu.memory_space<vmem>>, %arg17: memref<2x16xf32, #tpu.memory_space<vmem>>) attributes {dimension_semantics = [#tpu.dimension_semantics<parallel>], iteration_bounds = array<i64: 1>, scalar_prefetch = 0 : i64, scratch_operands = 0 : i64, tpu.core_type = #tpu.core_type<tc>, window_params = [{transform_indices = @transform_0, window_bounds = array<i64: 2, 16>}, {transform_indices = @transform_1, window_bounds = array<i64: 2, 32>}, {transform_indices = @transform_2, window_bounds = array<i64: 2, 16>}, {transform_indices = @transform_3, window_bounds = array<i64: 2, 16>}, {transform_indices = @transform_4, window_bounds = array<i64: 2, 1>}, {transform_indices = @transform_5, window_bounds = array<i64: 2, 1>}, {pipeline_mode = #tpu.pipeline_mode<synchronous>, transform_indices = @transform_6, window_bounds = array<i64: 16, 32>}, {pipeline_mode = #tpu.pipeline_mode<synchronous>, transform_indices = @transform_7, window_bounds = array<i64: 1, 32>}, {pipeline_mode = #tpu.pipeline_mode<synchronous>, transform_indices = @transform_8, window_bounds = array<i64: 32, 32>}, {pipeline_mode = #tpu.pipeline_mode<synchronous>, transform_indices = @transform_9, window_bounds = array<i64: 1, 32>}, {pipeline_mode = #tpu.pipeline_mode<synchronous>, transform_indices = @transform_10, window_bounds = array<i64: 32, 16>}, {pipeline_mode = #tpu.pipeline_mode<synchronous>, transform_indices = @transform_11, window_bounds = array<i64: 1, 16>}, {pipeline_mode = #tpu.pipeline_mode<synchronous>, transform_indices = @transform_12, window_bounds = array<i64: 16, 32>}, {pipeline_mode = #tpu.pipeline_mode<synchronous>, transform_indices = @transform_13, window_bounds = array<i64: 1, 32>}, {transform_indices = @transform_14, window_bounds = array<i64: 2, 32>}, {transform_indices = @transform_15, window_bounds = array<i64: 2, 32>}, {transform_indices = @transform_16, window_bounds = array<i64: 2, 16>}]} {
    %c0 = arith.constant 0 : index
    %c0_0 = arith.constant 0 : index
    %0 = vector.load %arg1[%c0, %c0_0] : memref<2x16xf32, #tpu.memory_space<vmem>>, vector<2x16xf32>
    %c0_1 = arith.constant 0 : index
    %c0_2 = arith.constant 0 : index
    %1 = vector.load %arg2[%c0_1, %c0_2] : memref<2x32xf32, #tpu.memory_space<vmem>>, vector<2x32xf32>
    %c0_3 = arith.constant 0 : index
    %c0_4 = arith.constant 0 : index
    %2 = vector.load %arg3[%c0_3, %c0_4] : memref<2x16xf32, #tpu.memory_space<vmem>>, vector<2x16xf32>
    %c0_5 = arith.constant 0 : index
    %c0_6 = arith.constant 0 : index
    %3 = vector.load %arg4[%c0_5, %c0_6] : memref<2x16xf32, #tpu.memory_space<vmem>>, vector<2x16xf32>
    %c0_7 = arith.constant 0 : index
    %c0_8 = arith.constant 0 : index
    %4 = vector.load %arg5[%c0_7, %c0_8] : memref<2x1xf32, #tpu.memory_space<vmem>>, vector<2x1xf32>
    %c0_9 = arith.constant 0 : index
    %c0_10 = arith.constant 0 : index
    %5 = vector.load %arg6[%c0_9, %c0_10] : memref<2x1xf32, #tpu.memory_space<vmem>>, vector<2x1xf32>
    %6 = arith.truncf %0 : vector<2x16xf32> to vector<2x16xbf16>
    %c0_11 = arith.constant 0 : index
    %c0_12 = arith.constant 0 : index
    %7 = vector.load %arg7[%c0_11, %c0_12] : memref<16x32xbf16, #tpu.memory_space<vmem>>, vector<16x32xbf16>
    %cst = arith.constant dense<0.000000e+00> : vector<2x32xf32>
    %8 = tpu.matmul %6, %7, %cst {dimension_numbers = #tpu.dot_dimension_numbers<[1], [0], [0], [1], [0, 0, 1, 1], [], []>} : vector<2x16xbf16>, vector<16x32xbf16>, vector<2x32xf32> -> vector<2x32xf32>
    %c0_13 = arith.constant 0 : index
    %c0_14 = arith.constant 0 : index
    %9 = vector.load %arg8[%c0_13, %c0_14] : memref<1x32xf32, #tpu.memory_space<vmem>>, vector<1x32xf32>
    %10 = vector.broadcast %9 : vector<1x32xf32> to vector<2x32xf32>
    %11 = arith.addf %8, %10 : vector<2x32xf32>
    %12 = arith.truncf %1 : vector<2x32xf32> to vector<2x32xbf16>
    %c0_15 = arith.constant 0 : index
    %c0_16 = arith.constant 0 : index
    %13 = vector.load %arg9[%c0_15, %c0_16] : memref<32x32xbf16, #tpu.memory_space<vmem>>, vector<32x32xbf16>
    %cst_17 = arith.constant dense<0.000000e+00> : vector<2x32xf32>
    %14 = tpu.matmul %12, %13, %cst_17 {dimension_numbers = #tpu.dot_dimension_numbers<[1], [0], [0], [1], [0, 0, 1, 1], [], []>} : vector<2x32xbf16>, vector<32x32xbf16>, vector<2x32xf32> -> vector<2x32xf32>
    %c0_18 = arith.constant 0 : index
    %c0_19 = arith.constant 0 : index
    %15 = vector.load %arg10[%c0_18, %c0_19] : memref<1x32xf32, #tpu.memory_space<vmem>>, vector<1x32xf32>
    %16 = vector.broadcast %15 : vector<1x32xf32> to vector<2x32xf32>
    %17 = arith.addf %14, %16 : vector<2x32xf32>
    %18 = arith.addf %11, %17 : vector<2x32xf32>
    %19 = vector.broadcast %4 : vector<2x1xf32> to vector<2x32xf32>
    %20 = arith.mulf %19, %18 : vector<2x32xf32>
    %21 = math.tanh %20 : vector<2x32xf32>
    %22 = arith.truncf %21 : vector<2x32xf32> to vector<2x32xbf16>
    %c0_20 = arith.constant 0 : index
    %c0_21 = arith.constant 0 : index
    %23 = vector.load %arg11[%c0_20, %c0_21] : memref<32x16xbf16, #tpu.memory_space<vmem>>, vector<32x16xbf16>
    %cst_22 = arith.constant dense<0.000000e+00> : vector<2x16xf32>
    %24 = tpu.matmul %22, %23, %cst_22 {dimension_numbers = #tpu.dot_dimension_numbers<[1], [0], [0], [1], [0, 0, 1, 1], [], []>} : vector<2x32xbf16>, vector<32x16xbf16>, vector<2x16xf32> -> vector<2x16xf32>
    %c0_23 = arith.constant 0 : index
    %c0_24 = arith.constant 0 : index
    %25 = vector.load %arg12[%c0_23, %c0_24] : memref<1x16xf32, #tpu.memory_space<vmem>>, vector<1x16xf32>
    %26 = vector.broadcast %25 : vector<1x16xf32> to vector<2x16xf32>
    %27 = arith.addf %24, %26 : vector<2x16xf32>
    %cst_25 = arith.constant dense<0xFF800000> : vector<2xf32>
    %28 = vector.multi_reduction <maximumf>, %27, %cst_25 [1] : vector<2x16xf32> to vector<2xf32>
    %29 = vector.shape_cast %28 : vector<2xf32> to vector<2x1xf32>
    %30 = vector.broadcast %29 : vector<2x1xf32> to vector<2x16xf32>
    %31 = arith.subf %27, %30 : vector<2x16xf32>
    %32 = math.exp %31 : vector<2x16xf32>
    %cst_26 = arith.constant dense<0.000000e+00> : vector<2xf32>
    %33 = vector.multi_reduction <add>, %32, %cst_26 [1] : vector<2x16xf32> to vector<2xf32>
    %34 = vector.shape_cast %33 : vector<2xf32> to vector<2x1xf32>
    %35 = math.log %34 : vector<2x1xf32>
    %36 = arith.addf %29, %35 : vector<2x1xf32>
    %37 = vector.broadcast %36 : vector<2x1xf32> to vector<2x16xf32>
    %38 = arith.subf %27, %37 : vector<2x16xf32>
    %39 = arith.mulf %38, %3 : vector<2x16xf32>
    %cst_27 = arith.constant 1.000000e+00 : f32
    %40 = vector.broadcast %cst_27 : f32 to vector<2x16xf32>
    %41 = arith.subf %40, %3 : vector<2x16xf32>
    %42 = arith.mulf %2, %41 : vector<2x16xf32>
    %43 = arith.addf %39, %42 : vector<2x16xf32>
    %44 = arith.negf %43 : vector<2x16xf32>
    %45 = math.exp %44 : vector<2x16xf32>
    %cst_28 = arith.constant 1.000000e+00 : f32
    %46 = vector.broadcast %cst_28 : f32 to vector<2x16xf32>
    %47 = arith.addf %46, %45 : vector<2x16xf32>
    %48 = arith.divf %46, %47 : vector<2x16xf32>
    %49 = vector.broadcast %5 : vector<2x1xf32> to vector<2x16xf32>
    %50 = arith.mulf %48, %49 : vector<2x16xf32>
    %cst_29 = arith.constant dense<0xFF800000> : vector<2xf32>
    %51 = vector.multi_reduction <maximumf>, %50, %cst_29 [1] : vector<2x16xf32> to vector<2xf32>
    %52 = vector.shape_cast %51 : vector<2xf32> to vector<2x1xf32>
    %53 = vector.broadcast %52 : vector<2x1xf32> to vector<2x16xf32>
    %54 = arith.subf %50, %53 : vector<2x16xf32>
    %55 = math.exp %54 : vector<2x16xf32>
    %cst_30 = arith.constant dense<0.000000e+00> : vector<2xf32>
    %56 = vector.multi_reduction <add>, %55, %cst_30 [1] : vector<2x16xf32> to vector<2xf32>
    %57 = vector.shape_cast %56 : vector<2xf32> to vector<2x1xf32>
    %58 = math.log %57 : vector<2x1xf32>
    %59 = arith.addf %52, %58 : vector<2x1xf32>
    %60 = vector.broadcast %59 : vector<2x1xf32> to vector<2x16xf32>
    %61 = arith.subf %50, %60 : vector<2x16xf32>
    %62 = arith.mulf %61, %0 : vector<2x16xf32>
    %c0_31 = arith.constant 0 : index
    %c0_32 = arith.constant 0 : index
    %63 = vector.load %arg13[%c0_31, %c0_32] : memref<16x32xf32, #tpu.memory_space<vmem>>, vector<16x32xf32>
    %cst_33 = arith.constant dense<0.000000e+00> : vector<2x32xf32>
    %64 = tpu.matmul %62, %63, %cst_33 {dimension_numbers = #tpu.dot_dimension_numbers<[1], [0], [0], [1], [0, 0, 1, 1], [], []>} : vector<2x16xf32>, vector<16x32xf32>, vector<2x32xf32> -> vector<2x32xf32>
    %c0_34 = arith.constant 0 : index
    %c0_35 = arith.constant 0 : index
    %65 = vector.load %arg14[%c0_34, %c0_35] : memref<1x32xf32, #tpu.memory_space<vmem>>, vector<1x32xf32>
    %66 = vector.broadcast %65 : vector<1x32xf32> to vector<2x32xf32>
    %67 = arith.addf %64, %66 : vector<2x32xf32>
    %68 = arith.negf %18 : vector<2x32xf32>
    %69 = math.exp %68 : vector<2x32xf32>
    %cst_36 = arith.constant 1.000000e+00 : f32
    %70 = vector.broadcast %cst_36 : f32 to vector<2x32xf32>
    %71 = arith.addf %70, %69 : vector<2x32xf32>
    %72 = arith.divf %70, %71 : vector<2x32xf32>
    %73 = arith.mulf %72, %17 : vector<2x32xf32>
    %74 = arith.addf %73, %11 : vector<2x32xf32>
    %75 = math.tanh %74 : vector<2x32xf32>
    %76 = arith.mulf %75, %72 : vector<2x32xf32>
    %cst_37 = arith.constant 1.000000e+00 : f32
    %77 = vector.broadcast %cst_37 : f32 to vector<2x32xf32>
    %78 = arith.subf %77, %72 : vector<2x32xf32>
    %79 = arith.mulf %1, %78 : vector<2x32xf32>
    %80 = arith.addf %76, %79 : vector<2x32xf32>
    %c0_38 = arith.constant 0 : index
    %c0_39 = arith.constant 0 : index
    %81 = vector.load %arg15[%c0_38, %c0_39] : memref<2x32xf32, #tpu.memory_space<vmem>>, vector<2x32xf32>
    tpu.vector_store %arg15[%c0_38, %c0_39], %80 {strides = array<i32>} : memref<2x32xf32, #tpu.memory_space<vmem>>, vector<2x32xf32>,
    %c0_40 = arith.constant 0 : index
    %c0_41 = arith.constant 0 : index
    %82 = vector.load %arg16[%c0_40, %c0_41] : memref<2x32xf32, #tpu.memory_space<vmem>>, vector<2x32xf32>
    tpu.vector_store %arg16[%c0_40, %c0_41], %67 {strides = array<i32>} : memref<2x32xf32, #tpu.memory_space<vmem>>, vector<2x32xf32>,
    %c0_42 = arith.constant 0 : index
    %c0_43 = arith.constant 0 : index
    %83 = vector.load %arg17[%c0_42, %c0_43] : memref<2x16xf32, #tpu.memory_space<vmem>>, vector<2x16xf32>
    tpu.vector_store %arg17[%c0_42, %c0_43], %48 {strides = array<i32>} : memref<2x16xf32, #tpu.memory_space<vmem>>, vector<2x16xf32>,
    return
  }
  func.func @transform_0(%arg0: i32) -> (i32, i32) {
    %c0_i32 = arith.constant 0 : i32
    %c0_i32_0 = arith.constant 0 : i32
    return %arg0, %c0_i32 : i32, i32
  }
  func.func @transform_1(%arg0: i32) -> (i32, i32) {
    %c0_i32 = arith.constant 0 : i32
    %c0_i32_0 = arith.constant 0 : i32
    return %arg0, %c0_i32 : i32, i32
  }
  func.func @transform_2(%arg0: i32) -> (i32, i32) {
    %c0_i32 = arith.constant 0 : i32
    %c0_i32_0 = arith.constant 0 : i32
    return %arg0, %c0_i32 : i32, i32
  }
  func.func @transform_3(%arg0: i32) -> (i32, i32) {
    %c0_i32 = arith.constant 0 : i32
    %c0_i32_0 = arith.constant 0 : i32
    return %arg0, %c0_i32 : i32, i32
  }
  func.func @transform_4(%arg0: i32) -> (i32, i32) {
    %c0_i32 = arith.constant 0 : i32
    %c0_i32_0 = arith.constant 0 : i32
    return %arg0, %c0_i32 : i32, i32
  }
  func.func @transform_5(%arg0: i32) -> (i32, i32) {
    %c0_i32 = arith.constant 0 : i32
    %c0_i32_0 = arith.constant 0 : i32
    return %arg0, %c0_i32 : i32, i32
  }
  func.func @transform_6(%arg0: i32) -> (i32, i32) {
    %c0_i32 = arith.constant 0 : i32
    %c0_i32_0 = arith.constant 0 : i32
    %c0_i32_1 = arith.constant 0 : i32
    return %c0_i32, %c0_i32_0 : i32, i32
  }
  func.func @transform_7(%arg0: i32) -> (i32, i32) {
    %c0_i32 = arith.constant 0 : i32
    %c0_i32_0 = arith.constant 0 : i32
    %c0_i32_1 = arith.constant 0 : i32
    return %c0_i32, %c0_i32_0 : i32, i32
  }
  func.func @transform_8(%arg0: i32) -> (i32, i32) {
    %c0_i32 = arith.constant 0 : i32
    %c0_i32_0 = arith.constant 0 : i32
    %c0_i32_1 = arith.constant 0 : i32
    return %c0_i32, %c0_i32_0 : i32, i32
  }
  func.func @transform_9(%arg0: i32) -> (i32, i32) {
    %c0_i32 = arith.constant 0 : i32
    %c0_i32_0 = arith.constant 0 : i32
    %c0_i32_1 = arith.constant 0 : i32
    return %c0_i32, %c0_i32_0 : i32, i32
  }
  func.func @transform_10(%arg0: i32) -> (i32, i32) {
    %c0_i32 = arith.constant 0 : i32
    %c0_i32_0 = arith.constant 0 : i32
    %c0_i32_1 = arith.constant 0 : i32
    return %c0_i32, %c0_i32_0 : i32, i32
  }
  func.func @transform_11(%arg0: i32) -> (i32, i32) {
    %c0_i32 = arith.constant 0 : i32
    %c0_i32_0 = arith.constant 0 : i32
    %c0_i32_1 = arith.constant 0 : i32
    return %c0_i32, %c0_i32_0 : i32, i32
  }
  func.func @transform_12(%arg0: i32) -> (i32, i32) {
    %c0_i32 = arith.constant 0 : i32
    %c0_i32_0 = arith.constant 0 : i32
    %c0_i32_1 = arith.constant 0 : i32
    return %c0_i32, %c0_i32_0 : i32, i32
  }
  func.func @transform_13(%arg0: i32) -> (i32, i32) {
    %c0_i32 = arith.constant 0 : i32
    %c0_i32_0 = arith.constant 0 : i32
    %c0_i32_1 = arith.constant 0 : i32
    return %c0_i32, %c0_i32_0 : i32, i32
  }
  func.func @transform_14(%arg0: i32) -> (i32, i32) {
    %c0_i32 = arith.constant 0 : i32
    %c0_i32_0 = arith.constant 0 : i32
    return %arg0, %c0_i32 : i32, i32
  }
  func.func @transform_15(%arg0: i32) -> (i32, i32) {
    %c0_i32 = arith.constant 0 : i32
    %c0_i32_0 = arith.constant 0 : i32
    return %arg0, %c0_i32 : i32, i32
  }
  func.func @transform_16(%arg0: i32) -> (i32, i32) {
    %c0_i32 = arith.constant 0 : i32
    %c0_i32_0 = arith.constant 0 : i32
    return %arg0, %c0_i32 : i32, i32
  }
}

</mosaic_0001>

<bundles_post_ra>
// kernel: tpu_custom_call.1
= control target key start
LH: loop header
LB: loop body
LE: loop exit
PB: predicated region body
PF: predicated region fallthrough
CT: control target
= control target key end

     0   :  { %s808_s0 = inlined_call_operand.vmem [shape: f32[2,16], index: 0, kind: input, shape index: {}]   ;;  %s809_s1 = inlined_call_operand.vmem [shape: f32[2,32], index: 1, kind: input, shape index: {}]   ;;  %s810_s2 = inlined_call_operand.hbm [shape: f32[2,16], index: 2, kind: input, shape index: {}]   ;;  %s811_s3 = inlined_call_operand.hbm [shape: f32[2,16], index: 3, kind: input, shape index: {}]   ;;  %s812_s4 = inlined_call_operand.vmem [shape: f32[2,1], index: 4, kind: input, shape index: {}]   ;;  %s813_s5 = inlined_call_operand.vmem [shape: f32[2,1], index: 5, kind: input, shape index: {}]   ;;  %s814_s6 = inlined_call_operand.vmem [shape: bf16[16,32], index: 6, kind: input, shape index: {}]   ;;  %s815_s7 = inlined_call_operand.vmem [shape: f32[1,32], index: 7, kind: input, shape index: {}]   ;;  %s816_s8 = inlined_call_operand.vmem [shape: bf16[32,32], index: 8, kind: input, shape index: {}]   ;;  %s817_s9 = inlined_call_operand.hbm [shape: f32[1,32], index: 9, kind: input, shape index: {}]   ;;  %s818_s10 = inlined_call_operand.vmem [shape: bf16[32,16], index: 10, kind: input, shape index: {}]   ;;  %s819_s11 = inlined_call_operand.vmem [shape: f32[1,16], index: 11, kind: input, shape index: {}]   ;;  %s820_s12 = inlined_call_operand.hbm [shape: f32[16,32], index: 12, kind: input, shape index: {}]   ;;  %s821_s13 = inlined_call_operand.vmem [shape: f32[1,32], index: 13, kind: input, shape index: {}]   ;;  %s822_s14 = inlined_call_operand.hbm [shape: f32[2,32], index: 14, kind: output, shape index: {0}]   ;;  %s823_s15 = inlined_call_operand.hbm [shape: f32[2,32], index: 15, kind: output, shape index: {1}]   ;;  %s824_s16 = inlined_call_operand.hbm [shape: f32[2,16], index: 16, kind: output, shape index: {2}]  }
   0x1   :  { %825 = sst [smem:[#allocation19_spill]] %s808_s0 }
   0x2   :  { %22 = vsyncpa [#allocation3], 0 }
   0x3   :  { %23 = vsyncpa [#allocation6], 0 }
   0x4   :  { %24 = vsyncpa [#allocation9], 0 }
   0x5   :  { %25 = vsyncpa [#allocation4], 0  ;;  %s47_s23 = sshll.u32 %s811_s3, 4  ;;  %s48_s23 = int_to_ptr.hbm [resolvable:$true] %s47_s23 }
   0x6   :  { %26 = vsyncpa [#allocation12], 0  ;;  %s640_s24 = smov [#allocation5]   ;;  %s36_s28 = sshll.u32 %s810_s2, 4  ;;  %s37_s28 = int_to_ptr.hbm [resolvable:$true] %s36_s28 }
   0x7   :  { %s49_s25 = sshll.u32 %s640_s24, 4  ;;  %s641_s29 = smov [#allocation2]   ;;  %s50_s25 = int_to_ptr.vmem [resolvable:$true] %s49_s25 }
   0x8   :  { %52 = dma.hbm_to_vmem [thread:$0]  %s48_s23, 32, %s50_s25, [#allocation6]  }
   0x9   :  { %s38_s30 = sshll.u32 %s641_s29, 4  ;;  %s68_s18 = sshll.u32 %s817_s9, 4  ;;  %s39_s30 = int_to_ptr.vmem [resolvable:$true] %s38_s30  ;;  %s69_s18 = int_to_ptr.hbm [resolvable:$true] %s68_s18 }
   0xa   :  { %41 = dma.hbm_to_vmem [thread:$0]  %s37_s28, 32, %s39_s30, [#allocation3]  }
   0xb   :  { %s82_s20 = sshll.u32 %s820_s12, 4  ;;  %s642_s21 = smov [#allocation7]   ;;  %s83_s20 = int_to_ptr.hbm [resolvable:$true] %s82_s20 }
   0xc   :  { %s70_s22 = sshll.u32 %s642_s21, 4  ;;  %s643_s2 = smov [#allocation8]   ;;  %s71_s22 = int_to_ptr.vmem [resolvable:$true] %s70_s22 }
   0xd   :  { %73 = dma.hbm_to_vmem [thread:$0]  %s69_s18, 16, %s71_s22, [#allocation6]  }
   0xe   :  { %s84_s23 = sshll.u32 %s643_s2, 4  ;;  %s644_s24 = smov 128   ;;  %s85_s23 = int_to_ptr.vmem [resolvable:$true] %s84_s23 }
   0xf   :  { %s645_s25 = smov 8  }
  0x10   :  { %90 = dma.hbm_to_vmem [thread:$0]  %s83_s20, 256, %s85_s23, [#allocation9], %s644_s24, %s644_s24, %s645_s25  }
  0x11   :  { %630 = dma.done.wait [#allocation3], 32  }
  0x12   :  { %631 = vsyncadd [#allocation3], 4294967264 }
  0x13   :  { %632 = dma.done.wait [#allocation6], 48  }
  0x14   :  { %633 = vsyncadd [#allocation6], 4294967248 }
  0x15   :  { %634 = dma.done.wait [#allocation9], 256  }
  0x16   :  { %635 = vsyncadd [#allocation9], 4294967040  ;;  %v646_v0 = vmov 0   ;;  %v421_v1 = vld [vmem:[%s814_s6] sm:$0xff]  ;;  %v423_v2 = vld [vmem:[%s816_s8 + $0x8] sm:$0xff]  ;;  %s826_s30 = sld [smem:[#allocation19_spill]] }
  0x17   :  { %436 = vset.pattern.permute.xlu0 %v646_v0  ;;  %437 = vset.pattern.permute.xlu1 %v646_v0  ;;  %vm129_vm0 = vcmask 130048   ;;  %v422_v5 = vld [vmem:[%s816_s8] sm:$0xff]  ;;  %vm167_vm1 = vcmask 261120   ;;  %v425_v9 = vld [vmem:[%s818_s10 + $0x8] sm:$0xff]  ;;  %vm341_vm6 = vcmask 254976   ;;  %vm229_vm7 = vcmask 123904  }
  0x18   :  { %v114_v6 = vld [vmem:[%s812_s4] sm:$0x3]  ;;  %140 = vmatpush.bf16.msra.mxu0 %v421_v1  ;;  %177 = vmatpush.bf16.msra.mxu1 %v423_v2  ;;  %v439_v13 = vld [vmem:[#allocation7] ss:$0 sm:$0xff]  ;;  %v113_v56 = vld [vmem:[#allocation5] sm:$0x3] }
  0x19   :  { %v111_v7 = vld [vmem:[%s809_s1] sm:$0x3]  ;;  %187 = vperm.xlu0 %436, %v114_v6   ;;  %222 = vmatpush.bf16.msra.mxu2 %v425_v9  ;;  %v244_v58 = vsub.f32 1.0, %v113_v56  ;;  %s352_s24 = sshll.u32 %s822_s14, 4  ;;  %s647_s25 = smov [#allocation10]   ;;  %s353_s24 = int_to_ptr.hbm [resolvable:$true] %s352_s24 }
  0x1a   :  { %v146_v8 = vpack.c.bf16 %v111_v7, %v111_v7  ;;  %v424_v10 = vld [vmem:[%s818_s10] sm:$0xff]  ;;  %s350_s9 = sshll.u32 %s647_s25, 4  ;;  %s648_s27 = smov [#allocation11]   ;;  %s351_s9 = int_to_ptr.vmem [resolvable:$true] %s350_s9 }
  0x1b   :  { %v438_v11 = vld [vmem:[%s815_s7] ss:$0 sm:$0xff]  ;;  %s361_s28 = sshll.u32 %s648_s27, 4  ;;  %s363_s0 = sshll.u32 %s823_s15, 4  ;;  %s362_s28 = int_to_ptr.vmem [resolvable:$true] %s361_s28  ;;  %s364_s0 = int_to_ptr.hbm [resolvable:$true] %s363_s0 }
  0x1c   :  { %v756_v3 = vld [vmem:[%s826_s30] sm:$0x3]  ;;  %178 = vmatpush.bf16.msra.mxu1 %v422_v5  ;;  %s649_s17 = smov [#allocation13]   ;;  %s374_s14 = sshll.u32 %s824_s16, 4  ;;  %s375_s14 = int_to_ptr.hbm [resolvable:$true] %s374_s14 }
  0x1d   :  { %v116_v4 = vpack.c.bf16 %v756_v3, %v756_v3  ;;  %223 = vmatpush.bf16.msra.mxu2 %v424_v10  ;;  %v440_v44 = vld [vmem:[%s819_s11] ss:$0 sm:$0xff]  ;;  %s372_s18 = sshll.u32 %s649_s17, 4  ;;  %s373_s18 = int_to_ptr.vmem [resolvable:$true] %s372_s18 }
  0x1e   :  { %v115_v54 = vld [vmem:[%s813_s5] sm:$0x3] }
  0x1f   :  { %399 = vmatmul.msk.bf16.vlgmr.msra.gmra.mxu0 %vm129_vm0, %v116_v4  ;;  %408 = vmatmul.msk.bf16.vlgmr.msra.gmra.mxu1 %vm167_vm1, %v146_v8  ;;  %v112_v60 = vld [vmem:[#allocation2] sm:$0x3] }
  0x20   :  { %v245_v62 = vmul.f32 %v244_v58, %v112_v60 }
  0x8b   :  { %v188_v17 = vpop.permute.xlu0 %187 }
  0x9c   :  { %v142_v12 = vpop.f32.mrf.mxu0  ;;  %v180_v15 = vpop.f32.mrf.mxu1 }
  0x9d   :  { %v143_v14 = vadd.f32 %v438_v11, %v142_v12  ;;  %v181_v16 = vadd.f32 %v439_v13, %v180_v15 }
  0x9f   :  { %v184_v18 = vadd.f32 %v181_v16, %v143_v14 }
  0xa1   :  { %v420_v20 = vmul.f32 -1.442695, %v184_v18  ;;  %v190_v21 = vmul.f32 %v188_v17, %v184_v18 }
  0xa3   :  { %442 = vpow2.f32 %v420_v20 }
  0xa4   :  { %v144_v19 = vpop.f32.mrf.mxu0  ;;  %444 = vtanh.f32 %v190_v21  ;;  %v182_v22 = vpop.f32.mrf.mxu1 }
  0xa9   :  { %v443_v23 = vpop.eup %442 }
  0xaa   :  { %v445_v24 = vpop.eup %444  ;;  %v318_v25 = vadd.f32 1.0, %v443_v23 }
  0xab   :  { %v192_v26 = vpack.c.bf16 %v445_v24, %v445_v24  ;;  %v287_v24 = vld [vmem:[#allocation8 + $0x8] sm:$0xff] }
  0xac   :  { %446 = vrcp.f32 %v318_v25  ;;  %v330_v30 = vand.u32 2147483648, %v318_v25  ;;  %v328_v32 = vand.u32 2147483647, %v318_v25  ;;  %vm324_vm3 = vweird.f32 %v318_v25  ;;  %309 = vmatpush.msra.mxu3 %v287_v24 }
  0xad   :  { %417 = vmatmul.msk.bf16.vlgmr.msra.gmra.mxu2 %vm167_vm1, %v192_v26 }
  0xae   :  { %v331_v34 = vor.u32 1.1754944e-38, %v330_v30  ;;  %vm329_vm5 = vcmp.eq.f32.partialorder %v328_v32, 8.507059e+37  ;;  %v441_v32 = vld [vmem:[%s821_s13] ss:$0 sm:$0xff] }
  0xb2   :  { %v447_v27 = vpop.eup %446 }
  0xb3   :  { %v320_v28 = vmul.f32 %v447_v27, %v318_v25  ;;  %vm325_vm2 = vweird.f32 %v447_v27  ;;  %v286_v25 = vld [vmem:[#allocation8] sm:$0xff] }
  0xb4   :  { %vm326_vm4 = vmor %vm324_vm3, %vm325_vm2  ;;  %310 = vmatpush.msra.mxu3 %v286_v25 }
  0xb5   :  { %v321_v29 = vsub.f32 1.0, %v320_v28 }
  0xb7   :  { %v322_v31 = vmul.f32 %v447_v27, %v321_v29 }
  0xb9   :  { %v323_v33 = vadd.f32 %v447_v27, %v322_v31 }
  0xbb   :  { %v327_v35 = vsel %vm326_vm4, %v447_v27, %v323_v33 }
  0xbc   :  { %v332_v36 = vsel %vm329_vm5, %v331_v34, %v327_v35 }
  0xbd   :  { %v334_v37 = vmul.f32 %v332_v36, %v181_v16  ;;  %v338_v39 = vsub.f32 1.0, %v332_v36 }
  0xbf   :  { %v335_v38 = vadd.f32 %v334_v37, %v143_v14  ;;  %v339_v42 = vmul.f32 %v338_v39, %v111_v7 }
  0xc1   :  { %448 = vtanh.f32 %v335_v38 }
  0xc7   :  { %v449_v40 = vpop.eup %448 }
  0xc8   :  { %v337_v41 = vmul.f32 %v449_v40, %v332_v36 }
  0xca   :  { %v340_v43 = vadd.f32 %v339_v42, %v337_v41 }
  0xcc   :  { %342 = vst.msk [vmem:[#allocation10] sm:$0x3] %vm341_vm6, %v340_v43 }
  0xcd   :  { %355 = dma.vmem_to_hbm [thread:$0]  %s351_s9, 32, %s353_s24, [#allocation4]  }
 0x130   :  { %v225_v45 = vpop.f32.mrf.mxu2 }
 0x131   :  { %v226_v46 = vadd.f32 %v440_v44, %v225_v45 }
 0x133   :  { %v230_v47 = vsel %vm229_vm7, %v226_v46, -inf }
 0x134   :  { %231 = vmax.xlane.f32.xlu0 %v230_v47 }
 0x138   :  { %v227_v48 = vpop.f32.mrf.mxu2 }
 0x1a7   :  { %v232_v49 = vpop.xlane.xlu0 %231 }
 0x1a8   :  { %v233_v50 = vsub.f32 %v226_v46, %v232_v49 }
 0x1aa   :  { %v234_v51 = vmul.f32 1.442695, %v233_v50 }
 0x1ac   :  { %450 = vpow2.f32 %v234_v51 }
 0x1b2   :  { %v451_v52 = vpop.eup %450 }
 0x1b3   :  { %v236_v53 = vsel %vm229_vm7, %v451_v52, 0.0 }
 0x1b4   :  { %237 = vadd.xlane.f32.xlu1 %v236_v53 }
 0x1cd   :  { %268 = vperm.xlu1 %437, %v115_v54  }
 0x227   :  { %v238_v55 = vpop.xlane.xlu1 %237 }
 0x228   :  { %452 = vlog2.f32 %v238_v55 }
 0x22e   :  { %v453_v57 = vpop.eup %452 }
 0x22f   :  { %v240_v59 = vmul.f32 0.6931472, %v453_v57 }
 0x231   :  { %v241_v61 = vadd.f32 %v240_v59, %v232_v49 }
 0x233   :  { %v242_v63 = vsub.f32 %v226_v46, %v241_v61 }
 0x235   :  { %v243_v0 = vmul.f32 %v242_v63, %v113_v56 }
 0x237   :  { %v246_v1 = vadd.f32 %v245_v62, %v243_v0 }
 0x239   :  { %v418_v2 = vmul.f32 -1.442695, %v246_v1 }
 0x23b   :  { %454 = vpow2.f32 %v418_v2 }
 0x23f   :  { %v269_v14 = vpop.permute.xlu1 %268 }
 0x241   :  { %v455_v4 = vpop.eup %454 }
 0x242   :  { %v250_v5 = vadd.f32 1.0, %v455_v4 }
 0x244   :  { %456 = vrcp.f32 %v250_v5  ;;  %v262_v9 = vand.u32 2147483648, %v250_v5  ;;  %v260_v11 = vand.u32 2147483647, %v250_v5  ;;  %vm256_vm9 = vweird.f32 %v250_v5 }
 0x246   :  { %v263_v13 = vor.u32 1.1754944e-38, %v262_v9  ;;  %vm261_vm11 = vcmp.eq.f32.partialorder %v260_v11, 8.507059e+37 }
 0x24a   :  { %v457_v6 = vpop.eup %456 }
 0x24b   :  { %v252_v7 = vmul.f32 %v457_v6, %v250_v5  ;;  %vm257_vm8 = vweird.f32 %v457_v6 }
 0x24c   :  { %vm258_vm10 = vmor %vm256_vm9, %vm257_vm8 }
 0x24d   :  { %v253_v8 = vsub.f32 1.0, %v252_v7 }
 0x24f   :  { %v254_v10 = vmul.f32 %v457_v6, %v253_v8 }
 0x251   :  { %v255_v12 = vadd.f32 %v457_v6, %v254_v10 }
 0x253   :  { %v259_v15 = vsel %vm258_vm10, %v457_v6, %v255_v12 }
 0x254   :  { %v264_v16 = vsel %vm261_vm11, %v263_v13, %v259_v15 }
 0x255   :  { %344 = vst.msk [vmem:[#allocation13] sm:$0x3] %vm229_vm7, %v264_v16  ;;  %v271_v17 = vmul.f32 %v269_v14, %v264_v16 }
 0x257   :  { %v272_v18 = vsel %vm229_vm7, %v271_v17, -inf }
 0x258   :  { %273 = vmax.xlane.f32.xlu2 %v272_v18 }
 0x2cb   :  { %v274_v19 = vpop.xlane.xlu2 %273 }
 0x2cc   :  { %v275_v20 = vsub.f32 %v271_v17, %v274_v19 }
 0x2ce   :  { %v276_v21 = vmul.f32 1.442695, %v275_v20 }
 0x2d0   :  { %458 = vpow2.f32 %v276_v21 }
 0x2d6   :  { %v459_v22 = vpop.eup %458 }
 0x2d7   :  { %v278_v23 = vsel %vm229_vm7, %v459_v22, 0.0 }
 0x2d8   :  { %279 = vadd.xlane.f32.xlu2 %v278_v23 }
 0x34b   :  { %v280_v26 = vpop.xlane.xlu2 %279 }
 0x34c   :  { %460 = vlog2.f32 %v280_v26 }
 0x352   :  { %v461_v27 = vpop.eup %460 }
 0x353   :  { %v282_v28 = vmul.f32 0.6931472, %v461_v27 }
 0x355   :  { %v283_v29 = vadd.f32 %v282_v28, %v274_v19 }
 0x357   :  { %v284_v30 = vsub.f32 %v271_v17, %v283_v29 }
 0x359   :  { %v285_v31 = vmul.f32 %v284_v30, %v756_v3 }
 0x35b   :  { %419 = vmatmul.msk.f32.vlgmr.msra.gmra.mxu3 %vm129_vm0, %v285_v31 }
 0x3de   :  { %v312_v3 = vpop.f32.mrf.mxu3 }
 0x3df   :  { %v313_v33 = vadd.f32 %v441_v32, %v312_v3 }
 0x3e1   :  { %343 = vst.msk [vmem:[#allocation11] sm:$0x3] %vm341_vm6, %v313_v33 }
 0x3e2   :  { %366 = dma.vmem_to_hbm [thread:$0]  %s362_s28, 32, %s364_s0, [#allocation12]  }
 0x3e3   :  { %377 = dma.vmem_to_hbm [thread:$0]  %s373_s18, 32, %s375_s14, [#allocation12]  }
 0x3e4   :  { %636 = dma.done.wait [#allocation4], 32  }
 0x3e5   :  { %637 = vsyncadd [#allocation4], 4294967264 }
 0x3e6   :  { %638 = dma.done.wait [#allocation12], 64  }
 0x3e7   :  { %639 = vsyncadd [#allocation12], 4294967232 }
 0x3e8   :  { %390 = vsyncpa [#allocation3], 1 }
 0x3e9   :  { %391 = vsyncpa [#allocation6], 1 }
 0x3ea   :  { %392 = vsyncpa [#allocation9], 1 }
 0x3eb   :  { %393 = vsyncpa [#allocation4], 1 }
 0x3ec   :  { %394 = vsyncpa [#allocation12], 1 }

</bundles_post_ra>
